<compile_context>
chip_gen: v7x
topology: tpu7x:2x2x1
jax: 0.10.0
libtpu: 0.0.40
codegen_flags: <defaults>
</compile_context>

<pallas_src>
import jax
import jax.numpy as jnp
from jax import lax
from jax.experimental import pallas as pl
from jax.experimental.pallas import tpu as pltpu

EPS = 1e-5          # torch.nn.InstanceNorm2d default eps
NEG_SLOPE = 0.2     # LeakyReLU slope
KSIZE = 4
STRIDE = 2
PAD = 1
_MAX_TILE_P = 1024  # 512-1024 lane tiles already reach ~85% of HBM roofline


def _round_up(a, m):
    return (a + m - 1) // m * m


def _vmem_params():
    """(vmem_limit_bytes, tile_budget_bytes) per TPU generation."""
    try:
        kind = jax.devices()[0].device_kind.lower()
    except Exception:  # pragma: no cover - be defensive about device queries
        kind = ""
    if "v7" in kind:
        limit = 48 * 1024 * 1024    # v7x: 64 MiB physical VMEM per core
    else:
        limit = 96 * 1024 * 1024    # v5e / v6e: 128 MiB physical VMEM
    budget = (3 * limit) // 4
    return limit, budget


def _pick_c_block(n, c_out, p_pad, out_bytes, budget):
    """Channel-block size: resident output block must fit a VMEM sub-budget;
    also split channels so both v7x TensorCores get parallel work at N=1."""
    resident_budget = max(budget // 3, 128 * 1024)
    cb = c_out
    while (cb * p_pad * out_bytes > resident_budget
           and cb % 2 == 0 and (cb // 2) % 8 == 0):
        cb //= 2
    if n * (c_out // cb) < 2 and cb % 2 == 0 and (cb // 2) % 8 == 0:
        cb //= 2
    return cb


def _pick_tile_p(p_pad, k_pad, c_block, out_bytes, budget):
    """Largest P tile (multiple of 128, divisor of p_pad) fitting the budget
    next to the resident output block and the double-buffered weight."""
    resident = c_block * p_pad * out_bytes
    w_bytes = 2 * c_block * k_pad * 2          # double-buffered bf16 weight
    avail = budget - resident - w_bytes
    cap = max(avail // (4 * k_pad), 128)        # double-buffered bf16 patches
    cap = min(cap, _MAX_TILE_P, p_pad)
    m = p_pad // 128
    best = 1
    d = 1
    while d * d <= m:
        if m % d == 0:
            for cand in (d, m // d):
                if cand * 128 <= cap and cand > best:
                    best = cand
        d += 1
    return best * 128


def _extract_patches_kp(x):
    """im2col for a 4x4 / stride 2 / pad 1 conv.  x: [N, C, H, W] (NCHW).

    Returns [N, K, P] with K = C*16 (order: c-major, then kh, kw — matching
    torch weight.reshape(C_out, C_in*16)) and P = H_out*W_out.
    """
    n, c, h, w = x.shape
    h_out = (h + 2 * PAD - KSIZE) // STRIDE + 1
    w_out = (w + 2 * PAD - KSIZE) // STRIDE + 1
    xp = jnp.pad(x, ((0, 0), (0, 0), (PAD, PAD), (PAD, PAD)))
    taps = []
    for kh in range(KSIZE):
        for kw in range(KSIZE):
            taps.append(xp[:, :, kh:kh + STRIDE * h_out:STRIDE,
                              kw:kw + STRIDE * w_out:STRIDE])   # [N,C,Ho,Wo]
    pats = jnp.stack(taps, axis=2)                              # [N,C,16,Ho,Wo]
    pats = pats.reshape(n, c * KSIZE * KSIZE, h_out * w_out)    # [N, K, P]
    return pats, h_out, w_out


def _make_fused_kernel(tile_p, p_count, normalize):
    inv_p = 1.0 / float(p_count)   # true spatial count (padding excluded)

    def kernel(patches_ref, w_ref, o_ref, sum_ref, sq_ref):
        # patches_ref: [K_pad, TILE_P] bf16   w_ref: [C_blk, K_pad] bf16
        # o_ref:       [C_blk, P_pad]  (resident across the P-tile axis)
        # sum_ref/sq_ref: [C_blk, 1] f32 scratch accumulators
        pt = pl.program_id(2)

        @pl.when(pt == 0)
        def _init():
            sum_ref[...] = jnp.zeros_like(sum_ref)
            sq_ref[...] = jnp.zeros_like(sq_ref)

        y = jnp.dot(w_ref[...], patches_ref[...],
                    preferred_element_type=jnp.float32)   # MXU, f32 accumulate
        # Fused single-traversal stats (padded K rows / P cols contribute 0).
        sum_ref[...] += jnp.sum(y, axis=1, keepdims=True)
        sq_ref[...] += jnp.sum(y * y, axis=1, keepdims=True)

        start = pl.multiple_of(pt * tile_p, tile_p)
        o_ref[:, pl.ds(start, tile_p)] = y.astype(o_ref.dtype)

        @pl.when(pt == pl.num_programs(2) - 1)
        def _finalize():
            yf = o_ref[...].astype(jnp.float32)
            if normalize:
                mean = sum_ref[...] * inv_p
                var = jnp.maximum(sq_ref[...] * inv_p - mean * mean, 0.0)
                rstd = lax.rsqrt(var + EPS)
                yf = (yf - mean) * rstd
            o_ref[...] = jnp.where(yf >= 0, yf, NEG_SLOPE * yf).astype(o_ref.dtype)

    return kernel


def unet_down(x, weight, normalize=True, compute_dtype=jnp.bfloat16):
    """x: [N, C_in, H, W] (NCHW), weight: [C_out, C_in, 4, 4] (torch layout).

    Returns [N, C_out, H//2, W//2] (NCHW).
    """
    n, c_in, h, w = x.shape
    c_out = weight.shape[0]
    out_dtype = x.dtype
    out_bytes = x.dtype.itemsize

    patches, h_out, w_out = _extract_patches_kp(x)      # [N, K, P]
    p = h_out * w_out
    k = c_in * KSIZE * KSIZE

    # Pad K (contraction / sublane dim) and P (lane dim) to multiples of 128;
    # zero padding is numerically free for the dot and the stats.
    k_pad = _round_up(k, 128)
    p_pad = _round_up(p, 128)

    vmem_limit, budget = _vmem_params()
    c_block = _pick_c_block(n, c_out, p_pad, out_bytes, budget)
    n_cb = c_out // c_block
    tile_p = _pick_tile_p(p_pad, k_pad, c_block, out_bytes, budget)
    n_pt = p_pad // tile_p

    patches = jnp.pad(patches, ((0, 0), (0, k_pad - k), (0, p_pad - p)))
    patches = patches.astype(compute_dtype)             # bf16 MXU inputs
    w_mat = weight.reshape(c_out, k)
    w_mat = jnp.pad(w_mat, ((0, 0), (0, k_pad - k))).astype(compute_dtype)

    kernel = _make_fused_kernel(tile_p, p, normalize)

    flops = 2 * n * c_out * k_pad * p_pad + 8 * n * c_out * p_pad
    bytes_accessed = (patches.size * 2 + w_mat.size * 2
                      + n * c_out * p_pad * out_bytes)

    out_padded = pl.pallas_call(
        kernel,
        out_shape=jax.ShapeDtypeStruct((n, c_out, p_pad), out_dtype),
        grid_spec=pltpu.PrefetchScalarGridSpec(
            num_scalar_prefetch=0,
            grid=(n, n_cb, n_pt),
            in_specs=[
                pl.BlockSpec((pl.Squeezed(), k_pad, tile_p),
                             lambda b, cb, t: (b, 0, t)),
                pl.BlockSpec((c_block, k_pad), lambda b, cb, t: (cb, 0)),
            ],
            # Same block index across the P-tile axis -> output block stays
            # resident in VMEM (accumulator pattern); written back once per
            # (batch, channel-block).
            out_specs=pl.BlockSpec((pl.Squeezed(), c_block, p_pad),
                                   lambda b, cb, t: (b, cb, 0)),
            scratch_shapes=[pltpu.VMEM((c_block, 1), jnp.float32),
                            pltpu.VMEM((c_block, 1), jnp.float32)],
        ),
        compiler_params=pltpu.CompilerParams(
            dimension_semantics=("parallel", "parallel", "arbitrary"),
            vmem_limit_bytes=vmem_limit),
        cost_estimate=pl.CostEstimate(flops=int(flops), transcendentals=0,
                                      bytes_accessed=int(bytes_accessed)),
    )(patches, w_mat)

    # Lane-dense [N, C_out, P_pad] -> NCHW is a (no-op when p_pad==p) slice
    # + plain reshape.
    out = out_padded if p_pad == p else out_padded[:, :, :p]
    return out.reshape(n, c_out, h_out, w_out)


def _reference(x, weight, compute_dtype=jnp.bfloat16):
    """Pure-JAX reference.  Inputs are cast to the same bf16 compute dtype as
    the kernel's MXU inputs (f32 accumulation), so the comparison is
    apples-to-apples."""
    y = lax.conv_general_dilated(
        x.astype(compute_dtype), weight.astype(compute_dtype),
        window_strides=(STRIDE, STRIDE),
        padding=((PAD, PAD), (PAD, PAD)),
        dimension_numbers=("NCHW", "OIHW", "NCHW"),
        preferred_element_type=jnp.float32)
    mean = jnp.mean(y, axis=(2, 3), keepdims=True)
    var = jnp.mean((y - mean) ** 2, axis=(2, 3), keepdims=True)
    y = (y - mean) * lax.rsqrt(var + EPS)
    y = jnp.where(y >= 0, y, NEG_SLOPE * y)
    return y.astype(x.dtype)


if __name__ == "__main__":
    key = jax.random.PRNGKey(0)
    kx, kw = jax.random.split(key)

    N, C_IN, C_OUT, H, W = 2, 4, 8, 16, 16
    x = jax.random.normal(kx, (N, C_IN, H, W), dtype=jnp.float32)
    # Deterministic conv weight (torch layout [C_out, C_in, 4, 4]),
    # kaiming-uniform-like scale.
    fan_in = C_IN * KSIZE * KSIZE
    bound = (1.0 / fan_in) ** 0.5
    weight = jax.random.uniform(kw, (C_OUT, C_IN, KSIZE, KSIZE),
                                dtype=jnp.float32, minval=-bound, maxval=bound)

    out = jax.jit(unet_down)(x, weight)
    out = jax.block_until_ready(out)

    ref = _reference(x, weight)
    assert out.shape == (N, C_OUT, H // 2, W // 2), out.shape
    max_err = float(jnp.max(jnp.abs(out - ref)))
    assert max_err < 1e-3, max_err

    print("KERNEL_OK")
</pallas_src>

<mosaic_0001>
module attributes {stable_mosaic.version = 11 : i64} {
  func.func @kernel(%arg0: i32, %arg1: i32, %arg2: i32, %arg3: memref<1x128x128xbf16, #tpu.memory_space<vmem>>, %arg4: memref<8x128xbf16, #tpu.memory_space<vmem>>, %arg5: memref<1x8x128xf32, #tpu.memory_space<vmem>>, %arg6: memref<8x1xf32, #tpu.memory_space<vmem>>, %arg7: memref<8x1xf32, #tpu.memory_space<vmem>>) attributes {dimension_semantics = [#tpu.dimension_semantics<parallel>, #tpu.dimension_semantics<parallel>, #tpu.dimension_semantics<arbitrary>], iteration_bounds = array<i64: 2, 1, 1>, scalar_prefetch = 0 : i64, scratch_operands = 2 : i64, tpu.core_type = #tpu.core_type<tc>, window_params = [{transform_indices = @transform_0, window_bounds = array<i64: 1, 128, 128>}, {transform_indices = @transform_1, window_bounds = array<i64: 8, 128>}, {transform_indices = @transform_2, window_bounds = array<i64: 1, 8, 128>}]} {
    %c0_i32 = arith.constant 0 : i32
    %0 = arith.cmpi eq, %arg2, %c0_i32 : i32
    %1 = arith.extui %0 : i1 to i32
    %c0_i32_0 = arith.constant 0 : i32
    %2 = arith.cmpi ne, %1, %c0_i32_0 : i32
    scf.if %2 {
      %cst_19 = arith.constant 0.000000e+00 : f32
      %27 = vector.broadcast %cst_19 : f32 to vector<8x1xf32>
      %c0_20 = arith.constant 0 : index
      %c0_21 = arith.constant 0 : index
      %28 = vector.load %arg6[%c0_20, %c0_21] : memref<8x1xf32, #tpu.memory_space<vmem>>, vector<8x1xf32>
      tpu.vector_store %arg6[%c0_20, %c0_21], %27 {strides = array<i32>} : memref<8x1xf32, #tpu.memory_space<vmem>>, vector<8x1xf32>,
      %cst_22 = arith.constant 0.000000e+00 : f32
      %29 = vector.broadcast %cst_22 : f32 to vector<8x1xf32>
      %c0_23 = arith.constant 0 : index
      %c0_24 = arith.constant 0 : index
      %30 = vector.load %arg7[%c0_23, %c0_24] : memref<8x1xf32, #tpu.memory_space<vmem>>, vector<8x1xf32>
      tpu.vector_store %arg7[%c0_23, %c0_24], %29 {strides = array<i32>} : memref<8x1xf32, #tpu.memory_space<vmem>>, vector<8x1xf32>,
    } else {
    }
    %c0 = arith.constant 0 : index
    %c0_1 = arith.constant 0 : index
    %3 = vector.load %arg4[%c0, %c0_1] : memref<8x128xbf16, #tpu.memory_space<vmem>>, vector<8x128xbf16>
    %c0_2 = arith.constant 0 : index
    %c0_3 = arith.constant 0 : index
    %c0_4 = arith.constant 0 : index
    %4 = vector.load %arg3[%c0_2, %c0_3, %c0_4] : memref<1x128x128xbf16, #tpu.memory_space<vmem>>, vector<1x128x128xbf16>
    %5 = vector.shape_cast %4 : vector<1x128x128xbf16> to vector<128x128xbf16>
    %cst = arith.constant dense<0.000000e+00> : vector<8x128xf32>
    %6 = tpu.matmul %3, %5, %cst {dimension_numbers = #tpu.dot_dimension_numbers<[1], [0], [0], [1], [0, 0, 1, 1], [], []>} : vector<8x128xbf16>, vector<128x128xbf16>, vector<8x128xf32> -> vector<8x128xf32>
    %c0_5 = arith.constant 0 : index
    %c0_6 = arith.constant 0 : index
    %7 = vector.load %arg6[%c0_5, %c0_6] : memref<8x1xf32, #tpu.memory_space<vmem>>, vector<8x1xf32>
    %cst_7 = arith.constant dense<0.000000e+00> : vector<8xf32>
    %8 = vector.multi_reduction <add>, %6, %cst_7 [1] : vector<8x128xf32> to vector<8xf32>
    %9 = vector.shape_cast %8 : vector<8xf32> to vector<8x1xf32>
    %10 = arith.addf %7, %9 : vector<8x1xf32>
    %c0_8 = arith.constant 0 : index
    %c0_9 = arith.constant 0 : index
    %11 = vector.load %arg6[%c0_8, %c0_9] : memref<8x1xf32, #tpu.memory_space<vmem>>, vector<8x1xf32>
    tpu.vector_store %arg6[%c0_8, %c0_9], %10 {strides = array<i32>} : memref<8x1xf32, #tpu.memory_space<vmem>>, vector<8x1xf32>,
    %c0_10 = arith.constant 0 : index
    %c0_11 = arith.constant 0 : index
    %12 = vector.load %arg7[%c0_10, %c0_11] : memref<8x1xf32, #tpu.memory_space<vmem>>, vector<8x1xf32>
    %13 = arith.mulf %6, %6 : vector<8x128xf32>
    %cst_12 = arith.constant dense<0.000000e+00> : vector<8xf32>
    %14 = vector.multi_reduction <add>, %13, %cst_12 [1] : vector<8x128xf32> to vector<8xf32>
    %15 = vector.shape_cast %14 : vector<8xf32> to vector<8x1xf32>
    %16 = arith.addf %12, %15 : vector<8x1xf32>
    %c0_13 = arith.constant 0 : index
    %c0_14 = arith.constant 0 : index
    %17 = vector.load %arg7[%c0_13, %c0_14] : memref<8x1xf32, #tpu.memory_space<vmem>>, vector<8x1xf32>
    tpu.vector_store %arg7[%c0_13, %c0_14], %16 {strides = array<i32>} : memref<8x1xf32, #tpu.memory_space<vmem>>, vector<8x1xf32>,
    %c128_i32 = arith.constant 128 : i32
    %18 = arith.muli %arg2, %c128_i32 : i32
    %19 = tpu.assume_multiple %18, 128 : i32
    %c0_15 = arith.constant 0 : index
    %c0_16 = arith.constant 0 : index
    %20 = arith.index_cast %19 : i32 to index
    %21 = vector.load %arg5[%c0_15, %c0_16, %20] : memref<1x8x128xf32, #tpu.memory_space<vmem>>, vector<1x8x128xf32>
    %22 = vector.shape_cast %21 : vector<1x8x128xf32> to vector<8x128xf32>
    %23 = vector.shape_cast %6 : vector<8x128xf32> to vector<1x8x128xf32>
    tpu.vector_store %arg5[%c0_15, %c0_16, %20], %23 {strides = array<i32>} : memref<1x8x128xf32, #tpu.memory_space<vmem>>, vector<1x8x128xf32>,
    %c0_i32_17 = arith.constant 0 : i32
    %24 = arith.cmpi eq, %arg2, %c0_i32_17 : i32
    %25 = arith.extui %24 : i1 to i32
    %c0_i32_18 = arith.constant 0 : i32
    %26 = arith.cmpi ne, %25, %c0_i32_18 : i32
    scf.if %26 {
      %c0_19 = arith.constant 0 : index
      %c0_20 = arith.constant 0 : index
      %c0_21 = arith.constant 0 : index
      %27 = vector.load %arg5[%c0_19, %c0_20, %c0_21] : memref<1x8x128xf32, #tpu.memory_space<vmem>>, vector<1x8x128xf32>
      %28 = vector.shape_cast %27 : vector<1x8x128xf32> to vector<8x128xf32>
      %c0_22 = arith.constant 0 : index
      %c0_23 = arith.constant 0 : index
      %29 = vector.load %arg6[%c0_22, %c0_23] : memref<8x1xf32, #tpu.memory_space<vmem>>, vector<8x1xf32>
      %cst_24 = arith.constant 1.562500e-02 : f32
      %30 = vector.broadcast %cst_24 : f32 to vector<8x1xf32>
      %31 = arith.mulf %29, %30 : vector<8x1xf32>
      %c0_25 = arith.constant 0 : index
      %c0_26 = arith.constant 0 : index
      %32 = vector.load %arg7[%c0_25, %c0_26] : memref<8x1xf32, #tpu.memory_space<vmem>>, vector<8x1xf32>
      %cst_27 = arith.constant 1.562500e-02 : f32
      %33 = vector.broadcast %cst_27 : f32 to vector<8x1xf32>
      %34 = arith.mulf %32, %33 : vector<8x1xf32>
      %35 = arith.mulf %31, %31 : vector<8x1xf32>
      %36 = arith.subf %34, %35 : vector<8x1xf32>
      %cst_28 = arith.constant 0.000000e+00 : f32
      %37 = vector.broadcast %cst_28 : f32 to vector<8x1xf32>
      %38 = arith.maximumf %36, %37 : vector<8x1xf32>
      %cst_29 = arith.constant 9.99999974E-6 : f32
      %39 = vector.broadcast %cst_29 : f32 to vector<8x1xf32>
      %40 = arith.addf %38, %39 : vector<8x1xf32>
      %41 = math.rsqrt %40 : vector<8x1xf32>
      %42 = vector.broadcast %31 : vector<8x1xf32> to vector<8x128xf32>
      %43 = arith.subf %28, %42 : vector<8x128xf32>
      %44 = vector.broadcast %41 : vector<8x1xf32> to vector<8x128xf32>
      %45 = arith.mulf %43, %44 : vector<8x128xf32>
      %cst_30 = arith.constant 0.000000e+00 : f32
      %46 = vector.broadcast %cst_30 : f32 to vector<8x128xf32>
      %47 = arith.cmpf oge, %45, %46 : vector<8x128xf32>
      %cst_31 = arith.constant 2.000000e-01 : f32
      %48 = vector.broadcast %cst_31 : f32 to vector<8x128xf32>
      %49 = arith.mulf %48, %45 : vector<8x128xf32>
      %50 = arith.select %47, %45, %49 : vector<8x128xi1>, vector<8x128xf32>
      %c0_32 = arith.constant 0 : index
      %c0_33 = arith.constant 0 : index
      %c0_34 = arith.constant 0 : index
      %51 = vector.load %arg5[%c0_32, %c0_33, %c0_34] : memref<1x8x128xf32, #tpu.memory_space<vmem>>, vector<1x8x128xf32>
      %52 = vector.shape_cast %51 : vector<1x8x128xf32> to vector<8x128xf32>
      %53 = vector.shape_cast %50 : vector<8x128xf32> to vector<1x8x128xf32>
      tpu.vector_store %arg5[%c0_32, %c0_33, %c0_34], %53 {strides = array<i32>} : memref<1x8x128xf32, #tpu.memory_space<vmem>>, vector<1x8x128xf32>,
    } else {
    }
    return
  }
  func.func @transform_0(%arg0: i32, %arg1: i32, %arg2: i32) -> (i32, i32, i32) {
    %c0_i32 = arith.constant 0 : i32
    %c0_i32_0 = arith.constant 0 : i32
    return %arg0, %c0_i32, %arg2 : i32, i32, i32
  }
  func.func @transform_1(%arg0: i32, %arg1: i32, %arg2: i32) -> (i32, i32) {
    %c0_i32 = arith.constant 0 : i32
    %c0_i32_0 = arith.constant 0 : i32
    return %arg1, %c0_i32 : i32, i32
  }
  func.func @transform_2(%arg0: i32, %arg1: i32, %arg2: i32) -> (i32, i32, i32) {
    %c0_i32 = arith.constant 0 : i32
    %c0_i32_0 = arith.constant 0 : i32
    return %arg0, %arg1, %c0_i32 : i32, i32, i32
  }
}

</mosaic_0001>

<bundles_post_ra>
// kernel: unet_down.1
= control target key start
LH: loop header
LB: loop body
LE: loop exit
PB: predicated region body
PF: predicated region fallthrough
CT: control target
= control target key end

     0   :  { %7 = vsyncpa [#allocation5], 0  ;;  %s1014_s0 = inlined_call_operand.hbm [shape: bf16[2,128,128], index: 0, kind: input, shape index: {}]   ;;  %s1015_s1 = inlined_call_operand.hbm [shape: bf16[8,128], index: 1, kind: input, shape index: {}]   ;;  %s1016_s2 = inlined_call_operand.hbm [shape: f32[2,8,128], index: 2, kind: output, shape index: {}]  }
   0x1   :  { %9 = vsyncpa [#allocation5 + $0x1], 0 }
   0x2   :  { %10 = vsyncpa [#allocation8], 0 }
   0x3   :  { %11 = vsyncpa [#allocation6], 0 }
   0x4   :  { %13 = vsyncpa [#allocation6 + $0x1], 0  ;;  %s790_s9 = smov 0   ;;  %s792_s10 = smov 0  }
   0x5   :  { %s794_s11 = smov 0   ;;  %s796_s12 = smov 0  }
   0x6   :  { %s798_s13 = smov 0   ;;  %s800_s14 = smov 0  }
   0x7 LB: > { %s477_s15 = sadd.s32 4294967295, %s765_s14   ;;  %s478_s16 = sadd.s32 4294967294, %s765_s14   ;;  %s765_s14 = sphi %s800_s14, %s19_s14   ;;  %s761_s13 = sphi %s798_s13, %s1044_s13   ;;  %s757_s12 = sphi %s796_s12, %s1043_s12   ;;  %s753_s11 = sphi %s794_s11, %s1042_s11   ;;  %s749_s10 = sphi %s792_s10, %s1041_s10   ;;  %s745_s9 = sphi %s790_s9, %s1040_s9  }
   0x8   : > { %s47_s17 = sadd.s32 1, %s753_s11  ;;  %p54_p0 = scmp.ne.s32.totalorder %s753_s11, %s749_s10 }
   0x9   : > { %p55_p1 = scmp.eq.s32.totalorder %s765_s14, 0  ;;  %p60_p2 = scmp.ne.s32.totalorder %s749_s10, %s745_s9 }
   0xa   : > { %p828_p3 = scmp.eq.s32.totalorder %s477_s15, 0  ;;  %p112_p4 = scmp.eq.s32.totalorder %s477_s15, 1 }
   0xb   : > { %p832_p5 = por %p55_p1, %p54_p0  ;;  %p118_p6 = scmp.eq.s32.totalorder %s478_s16, 1 }
   0xc   : > { %s1023_s18 = scalar_select %p828_p3, 1, 0 }
   0xd   : > { %p838_p7 = por %p828_p3, %p60_p2  ;;  %p842_p8 = por %p112_p4, %p54_p0 }
   0xe   : > { %p846_p9 = por %p118_p6, %p60_p2  ;;  %p479_p10 = scmp.ge.s32.totalorder %s765_s14, 1 }
   0xf   : > { %s1025_s20 = scalar_select %p838_p7, 1, 0 }
  0x10   : > { %s1026_s21 = scalar_select %p842_p8, 1, 0 }
  0x11   : > { %s1027_s22 = scalar_select %p846_p9, 1, 0 }
  0x12   : > { %p125_p11 = scmp.lt.s32.totalorder %s765_s14, 3  ;;  %s767_s24 = smov [#allocation7]  }
  0x13   : > { %s140_s25 = sshll.u32 %s767_s24, 4  ;;  %p552_p1 = scmp.lt.s32.totalorder %s765_s14, 2  ;;  %s141_s25 = int_to_ptr.vmem [resolvable:$true] %s140_s25 }
  0x14   : > { %p853_p13 = pnand %p479_p10, %p125_p11  ;;  %s38_s28 = sadd.s32 1, %s761_s13 }
  0x15   : > { %p862_p4 = pnand %p552_p1, %p832_p5  ;;  %p873_p6 = scmp.ge.s32.totalorder %s38_s28, 2 }
  0x16   : > { %s1028_s23 = scalar_select %p853_p13, 1, 0 }
  0x17   : > { %p539_p0 = pneg %p853_p13  ;;  %s151_s30 = sand.u32 1, %s753_s11  }
  0x18   : > { %s1029_s26 = scalar_select %p862_p4, 1, 0 }
  0x19   : > { %p868_p2 = pnand %p539_p0, %p828_p3  ;;  %s621_s5 = scalar_lea.hbm %s1015_s1, 64 }
  0x1a   : > { %s1031_s29 = scalar_select %p873_p6, 1, 0 }
  0x1b   : > { %p622_p5 = scmp.ne.s32.totalorder %s1015_s1, %s621_s5  ;;  %p623_p10 = pneg %p868_p2 }
  0x1c   : > { %p628_p0 = scmp.lt.u32.totalorder %s621_s5, %s1015_s1 }
  0x1d   : > { %p624_p11 = pnand %p623_p10, %p622_p5 }
  0x1f   : > { %p625_p1 = pneg %p624_p11 }
  0x21   : > { %p630_p12 = pnand %p628_p0, %p625_p1 }
  0x23   : > { %633 = shalt.err (!%p630_p12)
}
  0x24   : > { %s634_s16 = scalar_lea.vmem %s141_s25, 64  ;;  %p642_p7 = scmp.lt.s32.totalorder %s141_s25, %s141_s25 }
  0x25   : > { %p635_p9 = scmp.ne.s32.totalorder %s141_s25, %s634_s16  ;;  %p643_p13 = scmp.lt.s32.totalorder %s634_s16, %s634_s16 }
  0x27   : > { %p637_p8 = pnand %p635_p9, %p623_p10  ;;  %p644_p4 = por %p643_p13, %p642_p7 }
  0x29   : > { %p638_p3 = pneg %p637_p8 }
  0x2b   : > { %p645_p6 = pnand %p644_p4, %p638_p3 }
  0x2d   : > { %648 = shalt.err (!%p645_p6)
}
  0x2e   : > { %542 = dma.hbm_to_vmem [thread:$0]  (!%p868_p2), %s1015_s1, 64, %s141_s25, [#allocation8]  }
  0x2f   : > { %p1032_p9 = scmp.ne.s32.totalorder %s1031_s29, 0  ;;  %s482_s3 = sshll.u32 %s151_s30, 6 }
  0x30   : > { %s501_s5 = sshll.u32 %s761_s13, 10  ;;  %s155_s8 = scalar_lea.vmem [#allocation4], %s482_s3 }
  0x31   : > { %s1046_s28 = smov (%p1032_p9, %s38_s28), 0  ;;  %s904_s7 = scalar_lea.hbm %s1014_s0, %s501_s5 }
  0x32   : > { %s42_s4 = ssub.s32 %s761_s13, %s1046_s28  ;;  %s163_s15 = sshll.u32 %s155_s8, 4  ;;  %s911_s15 = int_to_ptr.vmem [resolvable:$true] %s163_s15 }
  0x33   : > { %p45_p3 = scmp.eq.s32.totalorder %s42_s4, 0  ;;  %s913_s29 = scalar_lea.sflag [#allocation5], %s151_s30 }
  0x34   : > { %s649_s16 = scalar_lea.hbm %s904_s7, 1024  ;;  %p1033_p8 = scmp.ne.s32.totalorder %s1029_s26, 0 }
  0x35   : > { %s909_s25 = scalar_select %p45_p3, %s753_s11, %s47_s17  }
  0x36   : > { %p650_p7 = scmp.ne.s32.totalorder %s904_s7, %s649_s16  ;;  %p651_p12 = pneg %p1033_p8 }
  0x37   : > { %s654_s3 = scalar_lea.hbm %s1014_s0, 2048  ;;  %p655_p2 = scmp.lt.u32.totalorder %s904_s7, %s1014_s0 }
  0x38   : > { %p652_p13 = pnand %p651_p12, %p650_p7  ;;  %p656_p6 = scmp.lt.u32.totalorder %s654_s3, %s649_s16 }
  0x39   : > { %p658_p10 = scmp.lt.u32.totalorder %s649_s16, %s904_s7 }
  0x3a   : > { %p653_p4 = pneg %p652_p13  ;;  %p657_p5 = por %p656_p6, %p655_p2 }
  0x3c   : > { %p659_p11 = por %p658_p10, %p657_p5 }
  0x3e   : > { %p660_p1 = pnand %p659_p11, %p653_p4 }
  0x40   : > { %663 = shalt.err (!%p660_p1)
}
  0x41   : > { %s664_s17 = scalar_lea.vmem %s911_s15, 1024  ;;  %s768_s30 = smov [#allocation4]  }
  0x42   : > { %p665_p0 = scmp.ne.s32.totalorder %s911_s15, %s664_s17  ;;  %s669_s27 = sshll.u32 %s768_s30, 4  ;;  %s670_s27 = int_to_ptr.vmem [resolvable:$false] %s669_s27 }
  0x43   : > { %s671_s6 = scalar_lea.vmem %s670_s27, 2048  ;;  %p672_p7 = scmp.lt.s32.totalorder %s911_s15, %s670_s27 }
  0x44   : > { %p667_p9 = pnand %p665_p0, %p651_p12  ;;  %p673_p13 = scmp.lt.s32.totalorder %s671_s6, %s664_s17 }
  0x46   : > { %p668_p3 = pneg %p667_p9  ;;  %p674_p2 = por %p673_p13, %p672_p7 }
  0x48   : > { %p675_p6 = pnand %p674_p2, %p668_p3 }
  0x4a   : > { %678 = shalt.err (!%p675_p6)
}
  0x4b   : > { %s769_s8 = smov 64   ;;  %s770_s16 = smov 4  }
  0x4c   : > { %546 = dma.hbm_to_vmem [thread:$0]  (!%p1033_p8), %s904_s7, 1024, %s911_s15, %s913_s29, %s769_s8, %s769_s8, %s770_s16  }
  0x4d   : > { %p1034_p12 = scmp.ne.s32.totalorder %s1028_s23, 0 }
  0x4e   : > { %s944_s19 = sand.u32 (!%p1034_p12), 1, %s749_s10   ;;  %p1035_p4 = scmp.ne.s32.totalorder (!%p1034_p12), %s1025_s20, 0 }
  0x4f   : > { %175 = sbr.rel (%p1034_p12) target bundleno = 657 (0x291), region = 28  ;;  %s486_s24 = sshll.u32 (!%p1034_p12), %s944_s19, 6 }
  0x50   : > { %s178_s3 = scalar_lea.sflag (!%p1034_p12), [#allocation5], %s944_s19  ;;  %s181_s4 = scalar_lea.vmem (!%p1034_p12), [#allocation4], %s486_s24 }
  0x56   : > { %732 = dma.done.wait (%p1035_p4), %s178_s3, 1024  }
  0x57   : > { %734 = vsyncadd (%p1035_p4), %s178_s3, 4294966272  ;;  %p1036_p5 = scmp.ne.s32.totalorder %s1023_s18, 0 }
  0x59   : > { %736 = dma.done.wait (%p1036_p5), [#allocation8], 64  }
  0x5a   : > { %738 = vsyncadd (%p1036_p5), [#allocation8], 4294967232  ;;  %v771_v0 = vmov 0.0   ;;  %vm772_vm0 = vmmov 0   ;;  %v611_v1 = vld [vmem:[%s181_s4] sm:$0xff]   ;;  %v612_v2 = vld [vmem:[%s181_s4 + $0x8] sm:$0xff]  }
  0x5b   : > { %511 = vmatprep.subr.bf16.mxu0 %v771_v0  ;;  %527 = vmatprep.mubr.msk.bf16.mxu0 %vm772_vm0, %v771_v0  ;;  %v613_v3 = vld [vmem:[%s181_s4 + $0x10] sm:$0xff]   ;;  %v614_v4 = vld [vmem:[%s181_s4 + $0x18] sm:$0xff]   ;;  %v615_v5 = vld [vmem:[%s181_s4 + $0x20] sm:$0xff]   ;;  %vm211_vm1 = vcmask 7168   ;;  %v773_v15 = vmov 0   ;;  %s488_s18 = sshll.u32 %s944_s19, 3 }
  0x5c   : > { %512 = vmatpush3.bf16.msra.mxu0 %v611_v1  ;;  %v616_v6 = vld [vmem:[%s181_s4 + $0x28] sm:$0xff]   ;;  %v617_v7 = vld [vmem:[%s181_s4 + $0x30] sm:$0xff]   ;;  %v618_v8 = vld [vmem:[%s181_s4 + $0x38] sm:$0xff]   ;;  %212 = vst.msk [vmem:[#allocation2] sm:$0xff] %vm211_vm1, %v771_v0  ;;  %609 = vset.pattern.permute.xlu1 %v773_v15  ;;  %s498_s20 = sshll.u32 %s757_s12, 7  ;;  %s205_s23 = scalar_lea.vmem [#allocation9], %s488_s18 }
  0x5d   : > { %513 = vmatprep.subr.bf16.mxu0 %v771_v0  ;;  %v214_v9 = vld [vmem:[#allocation7] sm:$0xf]  ;;  %213 = vst.msk [vmem:[#allocation3] sm:$0xff] %vm211_vm1, %v771_v0  ;;  %610 = vset.pattern.permute.xlu0 %v773_v15  ;;  %s380_s26 = sshll.u32 %s205_s23, 4  ;;  %s965_s29 = scalar_lea.hbm %s1016_s2, %s498_s20  ;;  %s967_s26 = int_to_ptr.vmem [resolvable:$true] %s380_s26 }
  0x5e   : > { %s366_s5 = scalar_lea.sflag [#allocation6], %s944_s19  ;;  %s679_s17 = scalar_lea.vmem %s967_s26, 128 }
  0x5f   : > { %p680_p8 = scmp.ne.s32.totalorder %s967_s26, %s679_s17  ;;  %p1037_p10 = scmp.ne.s32.totalorder %s1026_s21, 0 }
  0x60   : > { %514 = vmatpush3.bf16.msra.mxu0 %v612_v2  ;;  %s774_s12 = smov [#allocation9]  }
  0x61   : > { %515 = vmatprep.subr.bf16.mxu0 %v771_v0  ;;  %p681_p11 = pnand %p680_p8, %p1037_p10  ;;  %s683_s30 = sshll.u32 %s774_s12, 4  ;;  %s684_s30 = int_to_ptr.vmem [resolvable:$false] %s683_s30 }
  0x62   : > { %s685_s27 = scalar_lea.vmem %s684_s30, 256  ;;  %p686_p0 = scmp.lt.s32.totalorder %s967_s26, %s684_s30 }
  0x63   : > { %v319_v16 = vld [vmem:[#allocation2] sm:$0xff]  ;;  %p682_p1 = pneg %p681_p11  ;;  %p687_p9 = scmp.lt.s32.totalorder %s685_s27, %s679_s17 }
  0x64   : > { %516 = vmatpush3.bf16.msra.mxu0 %v613_v3  ;;  %v325_v19 = vld [vmem:[#allocation3] sm:$0xff] }
  0x65   : > { %517 = vmatprep.subr.bf16.mxu0 %v771_v0  ;;  %p688_p3 = por %p687_p9, %p686_p0 }
  0x67   : > { %p689_p7 = pnand %p688_p3, %p682_p1 }
  0x68   : > { %518 = vmatpush3.bf16.msra.mxu0 %v614_v4 }
  0x69   : > { %519 = vmatprep.subr.bf16.mxu0 %v771_v0 }
  0x6c   : > { %520 = vmatpush3.bf16.msra.mxu0 %v615_v5 }
  0x6d   : > { %521 = vmatprep.subr.bf16.mxu0 %v771_v0 }
  0x70   : > { %522 = vmatpush3.bf16.msra.mxu0 %v616_v6 }
  0x71   : > { %523 = vmatprep.subr.bf16.mxu0 %v771_v0 }
  0x74   : > { %524 = vmatpush3.bf16.msra.mxu0 %v617_v7 }
  0x75   : > { %525 = vmatprep.subr.bf16.mxu0 %v771_v0 }
  0x78   : > { %526 = vmatpush3.bf16.msra.mxu0 %v618_v8 }
  0x7b   : > { %528 = vmatmul.mubr.bf16.vlgmr.msra.gmra.mrb[0].mxu0 %v214_v9 }
 0x14e   : > { %v313_v10 = vpop.f32.mrb[0].mxu0 }
 0x14f   : > { %320 = vadd.xlane.f32.xlu0 %v313_v10  ;;  %v529_v11 = vpop.f32.mrb[1].mxu0  ;;  %v326_v14 = vmul.f32 %v313_v10, %v313_v10 }
 0x150   : > { %v316_v12 = vpop.f32.mrb[2].mxu0 }
 0x151   : > { %v530_v13 = vpop.f32.mrb[3].mxu0 }
 0x153   : > { %327 = vadd.xlane.f32.xlu0 %v326_v14 }
 0x1dc   : > { %v321_v17 = vpop.xlane.xlu0 %320 }
 0x1dd   : > { %v322_v18 = vadd.f32 %v321_v17, %v319_v16 }
 0x1df   : > { %324 = vst.msk [vmem:[#allocation2] sm:$0xff] %vm211_vm1, %v322_v18 }
 0x1e0   : > { %v328_v20 = vpop.xlane.xlu0 %327 }
 0x1e1   : > { %v329_v21 = vadd.f32 %v328_v20, %v325_v19 }
 0x1e3   : > { %330 = vst.msk [vmem:[#allocation3] sm:$0xff] %vm211_vm1, %v329_v21 }
 0x1e6   : > { %v340_v22 = vld [vmem:[#allocation2] sm:$0xff] }
 0x1e7   : > { %v341_v23 = vmul.f32 0.015625, %v340_v22 }
 0x1e9   : > { %351 = vperm.xlu1 %609, %v341_v23   ;;  %v344_v26 = vmul.f32 %v341_v23, %v341_v23 }
 0x1ea   : > { %v342_v24 = vld [vmem:[#allocation3] sm:$0xff] }
 0x1eb   : > { %v343_v25 = vmul.f32 0.015625, %v342_v24 }
 0x1ed   : > { %v345_v27 = vsub.f32 %v343_v25, %v344_v26 }
 0x1ef   : > { %v346_v28 = vmax.f32 %v345_v27, 0.0 }
 0x1f1   : > { %v347_v29 = vadd.f32 1e-05, %v346_v28 }
 0x1f3   : > { %619 = vrsqrt.f32 %v347_v29 }
 0x1fd   : > { %v620_v30 = vpop.eup %619 }
 0x1fe   : > { %357 = vperm.xlu1 %609, %v620_v30  }
 0x268   : > { %v352_v31 = vpop.permute.xlu1 %351 }
 0x269   : > { %v354_v32 = vsub.f32 %v313_v10, %v352_v31 }
 0x27d   : > { %v358_v33 = vpop.permute.xlu1 %357 }
 0x27e   : > { %v360_v34 = vmul.f32 %v358_v33, %v354_v32 }
 0x280   : > { %vm361_vm2 = vcmp.ge.f32.partialorder %v360_v34, 0.0  ;;  %v362_v35 = vmul.f32 0.2, %v360_v34 }
 0x282   : > { %v363_v36 = vsel %vm361_vm2, %v360_v34, %v362_v35 }
 0x283   : > { %364 = vst [vmem:[%s205_s23] sm:$0xff] %v363_v36 }
 0x284   : > { %692 = shalt.err (!%p689_p7)
}
 0x285   : > { %s693_s6 = scalar_lea.hbm %s965_s29, 128  ;;  %s697_s19 = scalar_lea.hbm %s1016_s2, 256 }
 0x286   : > { %p694_p13 = scmp.ne.s32.totalorder %s965_s29, %s693_s6  ;;  %p698_p12 = scmp.lt.u32.totalorder %s965_s29, %s1016_s2 }
 0x287   : > { %p699_p4 = scmp.lt.u32.totalorder %s697_s19, %s693_s6  ;;  %p701_p8 = scmp.lt.u32.totalorder %s693_s6, %s965_s29 }
 0x288   : > { %p695_p2 = pnand %p694_p13, %p1037_p10 }
 0x289   : > { %p700_p5 = por %p699_p4, %p698_p12 }
 0x28a   : > { %p696_p6 = pneg %p695_p2 }
 0x28b   : > { %p702_p11 = por %p701_p8, %p700_p5 }
 0x28d   : > { %p703_p1 = pnand %p702_p11, %p696_p6 }
 0x28f   : > { %706 = shalt.err (!%p703_p1)
}
 0x290   : > { %537 = dma.vmem_to_hbm [thread:$0]  (%p1037_p10), %s967_s26, 128, %s965_s29, %s366_s5  }
 0x291 PF: > { %s392_s4 = sand.u32 1, %s745_s9   ;;  %p1038_p0 = scmp.ne.s32.totalorder %s1027_s22, 0 }
 0x292   : > { %p1039_p9 = scmp.ge.s32.totalorder %s765_s14, 2  ;;  %s393_s18 = scalar_lea.sflag [#allocation6], %s392_s4 }
 0x294   : > { %p548_p3 = pnand %p1039_p9, %p1038_p0 }
 0x296   : > { %740 = dma.done.wait (!%p548_p3), %s393_s18, 128  }
 0x297   : > { %742 = vsyncadd (!%p548_p3), %s393_s18, 4294967168  ;;  %s19_s14 = sadd.s32 1, %s765_s14   ;;  %s1040_s9 = smov %s749_s10 }
 0x298   : > { %p16_p7 = scmp.ge.s32.totalorder %s19_s14, 4   ;;  %s1041_s10 = smov %s753_s11 }
 0x299   : > { %s1042_s11 = smov %s909_s25  ;;  %s1043_s12 = smov %s761_s13 }
 0x29a   : > { %s1044_s13 = smov %s1046_s28  ;;  %18 = sbr.rel (!%p16_p7) target bundleno = 7 (0x7), region = 87 }
 0x2a1   :  { %398 = vsyncpa [#allocation5], 1 }
 0x2a2   :  { %400 = vsyncpa [#allocation5 + $0x1], 1 }
 0x2a3   :  { %401 = vsyncpa [#allocation8], 1 }
 0x2a4   :  { %402 = vsyncpa [#allocation6], 1 }
 0x2a5   :  { %404 = vsyncpa [#allocation6 + $0x1], 1 }

</bundles_post_ra>
